<compile_context>
chip_gen: v7x
topology: tpu7x:2x2x1
jax: 0.10.0
libtpu: 0.0.40
codegen_flags: <defaults>
</compile_context>

<pallas_src>
import functools

import jax
import jax.numpy as jnp
from jax import lax
from jax.experimental import pallas as pl
from jax.experimental.pallas import tpu as pltpu


def _round_up(x, m):
    return ((x + m - 1) // m) * m


# ----------------------------------------------------------------------------
# Kernels
# ----------------------------------------------------------------------------
def _mlp_kernel_hidden(x_ref, in_w_ref, in_b_ref, fc2_w_ref, fc2_b_ref,
                       out_w_ref, out_b_ref, o_ref, h_scratch, *,
                       n_hidden_layers):
    """One batch tile of the full MLP (toggle > 1 path).

    x_ref:     [tm, K_pad]      in_w_ref:  [K_pad, H_pad]   in_b_ref:  [1, H_pad]
    fc2_w_ref: [H_pad, H_pad]   fc2_b_ref: [1, H_pad]
    out_w_ref: [H_pad, O_pad]   out_b_ref: [1, O_pad]
    o_ref:     [tm, O_pad]      h_scratch: VMEM [tm, H_pad] f32
    """
    # ---- in_proj + ReLU --------------------------------------------------
    h = jnp.dot(x_ref[...], in_w_ref[...], preferred_element_type=jnp.float32)
    h_scratch[...] = jnp.maximum(h + in_b_ref[...], 0.0)

    # ---- (toggle - 1) x (fc2 + ReLU), unrolled in-kernel ------------------
    fc2_w = fc2_w_ref[...]
    # Hoist the bias broadcast out of the loop.
    fc2_b = jnp.broadcast_to(fc2_b_ref[...], h_scratch.shape)

    def body(_, hh):
        y = jnp.dot(hh, fc2_w, preferred_element_type=jnp.float32)
        return jnp.maximum(y + fc2_b, 0.0)

    h_scratch[...] = lax.fori_loop(0, n_hidden_layers, body, h_scratch[...],
                                   unroll=True)

    # ---- out_proj (no activation) -----------------------------------------
    y = jnp.dot(h_scratch[...], out_w_ref[...],
                preferred_element_type=jnp.float32)
    o_ref[...] = (y + out_b_ref[...]).astype(o_ref.dtype)


def _mlp_kernel_no_hidden(x_ref, in_w_ref, in_b_ref, out_w_ref, out_b_ref,
                          o_ref, h_scratch):
    """toggle <= 1 path: fc2 never touched, so its weights are never DMA'd."""
    h = jnp.dot(x_ref[...], in_w_ref[...], preferred_element_type=jnp.float32)
    h_scratch[...] = jnp.maximum(h + in_b_ref[...], 0.0)
    y = jnp.dot(h_scratch[...], out_w_ref[...],
                preferred_element_type=jnp.float32)
    o_ref[...] = (y + out_b_ref[...]).astype(o_ref.dtype)


# ----------------------------------------------------------------------------
# Wrapper
# ----------------------------------------------------------------------------
def _choose_tile_m(M, K_pad, H_pad, O_pad, tm_max, budget_bytes=12 << 20):
    """Largest batch tile (multiple of 8) whose per-step VMEM footprint fits a
    conservative budget (safe for v5e/v6e default scoped VMEM and v7x 64 MiB)."""
    M8 = _round_up(max(M, 1), 8)
    tm = min(_round_up(max(tm_max, 8), 8), M8)
    weight_bytes = 4 * (K_pad * H_pad + H_pad * H_pad + H_pad * O_pad
                        + 2 * H_pad + O_pad)

    def footprint(t):
        # resident weights (count x2 for buffering) + double-buffered x/out
        # tiles + hidden-activation scratch.
        return 2 * weight_bytes + 4 * (2 * t * K_pad + 2 * t * O_pad
                                       + t * H_pad)

    while tm > 8 and footprint(tm) > budget_bytes:
        tm -= 8
    return tm


def _fused_mlp_impl(x, in_w, in_b, fc2_w, fc2_b, out_w, out_b, *, toggle,
                    tm_max):
    """Single fused pallas_call for the whole Net forward pass.

    Weights are pre-transposed ([in, out]) so each layer is y = x @ W + b.
    Everything is zero-padded to (8,128)-aligned shapes; the zero padding
    cannot change the result.
    """
    orig_shape = x.shape
    K = orig_shape[-1]
    x2 = x.reshape(-1, K)                  # torch.nn.Linear-style flattening
    M = x2.shape[0]
    H = in_w.shape[1]
    O = out_w.shape[1]

    K_pad = _round_up(K, 128)
    H_pad = _round_up(H, 128)
    O_pad = _round_up(O, 128)

    tm = _choose_tile_m(M, K_pad, H_pad, O_pad, tm_max)
    M_pad = _round_up(max(M, 1), tm)

    f32 = jnp.float32
    xp = jnp.zeros((M_pad, K_pad), f32).at[:M, :K].set(x2.astype(f32))
    in_wp = jnp.zeros((K_pad, H_pad), f32).at[:K, :H].set(in_w.astype(f32))
    in_bp = jnp.zeros((1, H_pad), f32).at[0, :H].set(in_b.astype(f32))
    out_wp = jnp.zeros((H_pad, O_pad), f32).at[:H, :O].set(out_w.astype(f32))
    out_bp = jnp.zeros((1, O_pad), f32).at[0, :O].set(out_b.astype(f32))

    n_hidden_layers = max(int(toggle) - 1, 0)

    # Block specs: x / out tiled over the batch grid; params VMEM-resident.
    x_spec = pl.BlockSpec((tm, K_pad), lambda i: (i, 0))
    in_w_spec = pl.BlockSpec((K_pad, H_pad), lambda i: (0, 0))
    in_b_spec = pl.BlockSpec((1, H_pad), lambda i: (0, 0))
    out_w_spec = pl.BlockSpec((H_pad, O_pad), lambda i: (0, 0))
    out_b_spec = pl.BlockSpec((1, O_pad), lambda i: (0, 0))
    o_spec = pl.BlockSpec((tm, O_pad), lambda i: (i, 0))

    if n_hidden_layers > 0:
        fc2_wp = jnp.zeros((H_pad, H_pad), f32).at[:H, :H].set(
            fc2_w.astype(f32))
        fc2_bp = jnp.zeros((1, H_pad), f32).at[0, :H].set(fc2_b.astype(f32))
        kernel = functools.partial(_mlp_kernel_hidden,
                                   n_hidden_layers=n_hidden_layers)
        in_specs = [x_spec, in_w_spec, in_b_spec,
                    pl.BlockSpec((H_pad, H_pad), lambda i: (0, 0)),
                    pl.BlockSpec((1, H_pad), lambda i: (0, 0)),
                    out_w_spec, out_b_spec]
        args = (xp, in_wp, in_bp, fc2_wp, fc2_bp, out_wp, out_bp)
    else:
        kernel = _mlp_kernel_no_hidden
        in_specs = [x_spec, in_w_spec, in_b_spec, out_w_spec, out_b_spec]
        args = (xp, in_wp, in_bp, out_wp, out_bp)

    yp = pl.pallas_call(
        kernel,
        out_shape=jax.ShapeDtypeStruct((M_pad, O_pad), f32),
        grid_spec=pltpu.PrefetchScalarGridSpec(
            num_scalar_prefetch=0,
            grid=(M_pad // tm,),
            in_specs=in_specs,
            out_specs=o_spec,
            scratch_shapes=[pltpu.VMEM((tm, H_pad), jnp.float32)],
        ),
        compiler_params=pltpu.CompilerParams(
            dimension_semantics=("parallel",),
        ),
    )(*args)

    y = yp[:M, :O]
    return y.reshape(orig_shape[:-1] + (O,))


# One compiled executable per (shape, toggle, tm_max): padding + kernel + slice
# all fuse into a single XLA program, so per-call dispatch overhead is minimal.
fused_mlp = jax.jit(_fused_mlp_impl, static_argnames=("toggle", "tm_max"))


class NetPallas:
    """Mirrors the PyTorch `Net` module's forward pass (ReLU activation)."""

    def __init__(self, input_size, hidden_size, output_size, toggle=1,
                 key=None):
        if key is None:
            key = jax.random.PRNGKey(0)
        k1, k2, k3, k4, k5, k6 = jax.random.split(key, 6)

        def init_linear(kw, kb, fan_in, fan_out):
            # PyTorch-style uniform init with bound 1/sqrt(fan_in);
            # stored pre-transposed as [in, out].
            bound = 1.0 / jnp.sqrt(fan_in)
            w_t = jax.random.uniform(kw, (fan_in, fan_out), jnp.float32,
                                     minval=-bound, maxval=bound)
            b = jax.random.uniform(kb, (fan_out,), jnp.float32,
                                   minval=-bound, maxval=bound)
            return w_t, b

        self.in_w, self.in_b = init_linear(k1, k2, input_size, hidden_size)
        self.out_w, self.out_b = init_linear(k3, k4, hidden_size, output_size)
        self.fc2_w, self.fc2_b = init_linear(k5, k6, hidden_size, hidden_size)
        self.toggle = int(toggle)

    def __call__(self, x, *, tm_max=512):
        return fused_mlp(x, self.in_w, self.in_b, self.fc2_w, self.fc2_b,
                         self.out_w, self.out_b, toggle=self.toggle,
                         tm_max=int(tm_max))


def reference_forward(net: NetPallas, x):
    """Pure-JAX reference for correctness check."""
    out = jnp.maximum(x @ net.in_w + net.in_b, 0.0)
    if net.toggle > 1:
        for _ in range(net.toggle - 1):
            out = jnp.maximum(out @ net.fc2_w + net.fc2_b, 0.0)
    return out @ net.out_w + net.out_b


if __name__ == "__main__":
    input_size, hidden_size, output_size = 32, 32, 16

    key = jax.random.PRNGKey(0)
    k_params, k_params1, k_x, k_x2, k_x3 = jax.random.split(key, 5)

    # --- toggle=3: exercises the in-kernel hidden-layer loop ---------------
    net = NetPallas(input_size, hidden_size, output_size, toggle=3,
                    key=k_params)

    x = jax.random.normal(k_x, (8, input_size), jnp.float32)
    y = jax.block_until_ready(net(x))
    y_ref = reference_forward(net, x)
    assert y.shape == (8, output_size)
    assert jnp.allclose(y, y_ref, atol=1e-5, rtol=1e-5)

    # --- multi-tile case: exercises the batch grid + row padding -----------
    x2 = jax.random.normal(k_x2, (300, input_size), jnp.float32)
    y2 = jax.block_until_ready(net(x2, tm_max=128))  # grid = (3,)
    y2_ref = reference_forward(net, x2)
    assert y2.shape == (300, output_size)
    assert jnp.allclose(y2, y2_ref, atol=1e-5, rtol=1e-5)

    # --- toggle=1: exercises the fc2-free kernel path -----------------------
    net1 = NetPallas(input_size, hidden_size, output_size, toggle=1,
                     key=k_params1)
    x3 = jax.random.normal(k_x3, (2, 4, input_size), jnp.float32)  # 3-D input
    y3 = jax.block_until_ready(net1(x3))
    y3_ref = reference_forward(net1, x3.reshape(-1, input_size)).reshape(
        2, 4, output_size)
    assert y3.shape == (2, 4, output_size)
    assert jnp.allclose(y3, y3_ref, atol=1e-5, rtol=1e-5)

    print("KERNEL_OK")
</pallas_src>

<mosaic_0001>
module attributes {stable_mosaic.version = 11 : i64} {
  func.func @_mlp_kernel_hidden(%arg0: i32, %arg1: memref<8x128xf32, #tpu.memory_space<vmem>>, %arg2: memref<128x128xf32, #tpu.memory_space<vmem>>, %arg3: memref<1x128xf32, #tpu.memory_space<vmem>>, %arg4: memref<128x128xf32, #tpu.memory_space<vmem>>, %arg5: memref<1x128xf32, #tpu.memory_space<vmem>>, %arg6: memref<128x128xf32, #tpu.memory_space<vmem>>, %arg7: memref<1x128xf32, #tpu.memory_space<vmem>>, %arg8: memref<8x128xf32, #tpu.memory_space<vmem>>, %arg9: memref<8x128xf32, #tpu.memory_space<vmem>>) attributes {dimension_semantics = [#tpu.dimension_semantics<parallel>], iteration_bounds = array<i64: 1>, scalar_prefetch = 0 : i64, scratch_operands = 1 : i64, tpu.core_type = #tpu.core_type<tc>, window_params = [{transform_indices = @transform_0, window_bounds = array<i64: 8, 128>}, {pipeline_mode = #tpu.pipeline_mode<synchronous>, transform_indices = @transform_1, window_bounds = array<i64: 128, 128>}, {pipeline_mode = #tpu.pipeline_mode<synchronous>, transform_indices = @transform_2, window_bounds = array<i64: 1, 128>}, {pipeline_mode = #tpu.pipeline_mode<synchronous>, transform_indices = @transform_3, window_bounds = array<i64: 128, 128>}, {pipeline_mode = #tpu.pipeline_mode<synchronous>, transform_indices = @transform_4, window_bounds = array<i64: 1, 128>}, {pipeline_mode = #tpu.pipeline_mode<synchronous>, transform_indices = @transform_5, window_bounds = array<i64: 128, 128>}, {pipeline_mode = #tpu.pipeline_mode<synchronous>, transform_indices = @transform_6, window_bounds = array<i64: 1, 128>}, {transform_indices = @transform_7, window_bounds = array<i64: 8, 128>}]} {
    %c0 = arith.constant 0 : index
    %c0_0 = arith.constant 0 : index
    %0 = vector.load %arg1[%c0, %c0_0] : memref<8x128xf32, #tpu.memory_space<vmem>>, vector<8x128xf32>
    %c0_1 = arith.constant 0 : index
    %c0_2 = arith.constant 0 : index
    %1 = vector.load %arg2[%c0_1, %c0_2] : memref<128x128xf32, #tpu.memory_space<vmem>>, vector<128x128xf32>
    %cst = arith.constant dense<0.000000e+00> : vector<8x128xf32>
    %2 = tpu.matmul %0, %1, %cst {dimension_numbers = #tpu.dot_dimension_numbers<[1], [0], [0], [1], [0, 0, 1, 1], [], []>} : vector<8x128xf32>, vector<128x128xf32>, vector<8x128xf32> -> vector<8x128xf32>
    %c0_3 = arith.constant 0 : index
    %c0_4 = arith.constant 0 : index
    %3 = vector.load %arg3[%c0_3, %c0_4] : memref<1x128xf32, #tpu.memory_space<vmem>>, vector<1x128xf32>
    %4 = vector.broadcast %3 : vector<1x128xf32> to vector<8x128xf32>
    %5 = arith.addf %2, %4 : vector<8x128xf32>
    %cst_5 = arith.constant 0.000000e+00 : f32
    %6 = vector.broadcast %cst_5 : f32 to vector<8x128xf32>
    %7 = arith.maximumf %5, %6 : vector<8x128xf32>
    %c0_6 = arith.constant 0 : index
    %c0_7 = arith.constant 0 : index
    %8 = vector.load %arg9[%c0_6, %c0_7] : memref<8x128xf32, #tpu.memory_space<vmem>>, vector<8x128xf32>
    tpu.vector_store %arg9[%c0_6, %c0_7], %7 {strides = array<i32>} : memref<8x128xf32, #tpu.memory_space<vmem>>, vector<8x128xf32>,
    %c0_8 = arith.constant 0 : index
    %c0_9 = arith.constant 0 : index
    %9 = vector.load %arg4[%c0_8, %c0_9] : memref<128x128xf32, #tpu.memory_space<vmem>>, vector<128x128xf32>
    %c0_10 = arith.constant 0 : index
    %c0_11 = arith.constant 0 : index
    %10 = vector.load %arg5[%c0_10, %c0_11] : memref<1x128xf32, #tpu.memory_space<vmem>>, vector<1x128xf32>
    %11 = vector.shape_cast %10 : vector<1x128xf32> to vector<1x128xf32>
    %12 = vector.broadcast %11 : vector<1x128xf32> to vector<8x128xf32>
    %c0_12 = arith.constant 0 : index
    %c0_13 = arith.constant 0 : index
    %13 = vector.load %arg9[%c0_12, %c0_13] : memref<8x128xf32, #tpu.memory_space<vmem>>, vector<8x128xf32>
    %c0_i32 = arith.constant 0 : i32
    %cst_14 = arith.constant dense<0.000000e+00> : vector<8x128xf32>
    %14 = tpu.matmul %13, %9, %cst_14 {dimension_numbers = #tpu.dot_dimension_numbers<[1], [0], [0], [1], [0, 0, 1, 1], [], []>} : vector<8x128xf32>, vector<128x128xf32>, vector<8x128xf32> -> vector<8x128xf32>
    %15 = arith.addf %14, %12 : vector<8x128xf32>
    %cst_15 = arith.constant 0.000000e+00 : f32
    %16 = vector.broadcast %cst_15 : f32 to vector<8x128xf32>
    %17 = arith.maximumf %15, %16 : vector<8x128xf32>
    %c1_i32 = arith.constant 1 : i32
    %cst_16 = arith.constant dense<0.000000e+00> : vector<8x128xf32>
    %18 = tpu.matmul %17, %9, %cst_16 {dimension_numbers = #tpu.dot_dimension_numbers<[1], [0], [0], [1], [0, 0, 1, 1], [], []>} : vector<8x128xf32>, vector<128x128xf32>, vector<8x128xf32> -> vector<8x128xf32>
    %19 = arith.addf %18, %12 : vector<8x128xf32>
    %cst_17 = arith.constant 0.000000e+00 : f32
    %20 = vector.broadcast %cst_17 : f32 to vector<8x128xf32>
    %21 = arith.maximumf %19, %20 : vector<8x128xf32>
    %c0_18 = arith.constant 0 : index
    %c0_19 = arith.constant 0 : index
    %22 = vector.load %arg9[%c0_18, %c0_19] : memref<8x128xf32, #tpu.memory_space<vmem>>, vector<8x128xf32>
    tpu.vector_store %arg9[%c0_18, %c0_19], %21 {strides = array<i32>} : memref<8x128xf32, #tpu.memory_space<vmem>>, vector<8x128xf32>,
    %c0_20 = arith.constant 0 : index
    %c0_21 = arith.constant 0 : index
    %23 = vector.load %arg9[%c0_20, %c0_21] : memref<8x128xf32, #tpu.memory_space<vmem>>, vector<8x128xf32>
    %c0_22 = arith.constant 0 : index
    %c0_23 = arith.constant 0 : index
    %24 = vector.load %arg6[%c0_22, %c0_23] : memref<128x128xf32, #tpu.memory_space<vmem>>, vector<128x128xf32>
    %cst_24 = arith.constant dense<0.000000e+00> : vector<8x128xf32>
    %25 = tpu.matmul %23, %24, %cst_24 {dimension_numbers = #tpu.dot_dimension_numbers<[1], [0], [0], [1], [0, 0, 1, 1], [], []>} : vector<8x128xf32>, vector<128x128xf32>, vector<8x128xf32> -> vector<8x128xf32>
    %c0_25 = arith.constant 0 : index
    %c0_26 = arith.constant 0 : index
    %26 = vector.load %arg7[%c0_25, %c0_26] : memref<1x128xf32, #tpu.memory_space<vmem>>, vector<1x128xf32>
    %27 = vector.broadcast %26 : vector<1x128xf32> to vector<8x128xf32>
    %28 = arith.addf %25, %27 : vector<8x128xf32>
    %c0_27 = arith.constant 0 : index
    %c0_28 = arith.constant 0 : index
    %29 = vector.load %arg8[%c0_27, %c0_28] : memref<8x128xf32, #tpu.memory_space<vmem>>, vector<8x128xf32>
    tpu.vector_store %arg8[%c0_27, %c0_28], %28 {strides = array<i32>} : memref<8x128xf32, #tpu.memory_space<vmem>>, vector<8x128xf32>,
    return
  }
  func.func @transform_0(%arg0: i32) -> (i32, i32) {
    %c0_i32 = arith.constant 0 : i32
    %c0_i32_0 = arith.constant 0 : i32
    return %arg0, %c0_i32 : i32, i32
  }
  func.func @transform_1(%arg0: i32) -> (i32, i32) {
    %c0_i32 = arith.constant 0 : i32
    %c0_i32_0 = arith.constant 0 : i32
    %c0_i32_1 = arith.constant 0 : i32
    return %c0_i32, %c0_i32_0 : i32, i32
  }
  func.func @transform_2(%arg0: i32) -> (i32, i32) {
    %c0_i32 = arith.constant 0 : i32
    %c0_i32_0 = arith.constant 0 : i32
    %c0_i32_1 = arith.constant 0 : i32
    return %c0_i32, %c0_i32_0 : i32, i32
  }
  func.func @transform_3(%arg0: i32) -> (i32, i32) {
    %c0_i32 = arith.constant 0 : i32
    %c0_i32_0 = arith.constant 0 : i32
    %c0_i32_1 = arith.constant 0 : i32
    return %c0_i32, %c0_i32_0 : i32, i32
  }
  func.func @transform_4(%arg0: i32) -> (i32, i32) {
    %c0_i32 = arith.constant 0 : i32
    %c0_i32_0 = arith.constant 0 : i32
    %c0_i32_1 = arith.constant 0 : i32
    return %c0_i32, %c0_i32_0 : i32, i32
  }
  func.func @transform_5(%arg0: i32) -> (i32, i32) {
    %c0_i32 = arith.constant 0 : i32
    %c0_i32_0 = arith.constant 0 : i32
    %c0_i32_1 = arith.constant 0 : i32
    return %c0_i32, %c0_i32_0 : i32, i32
  }
  func.func @transform_6(%arg0: i32) -> (i32, i32) {
    %c0_i32 = arith.constant 0 : i32
    %c0_i32_0 = arith.constant 0 : i32
    %c0_i32_1 = arith.constant 0 : i32
    return %c0_i32, %c0_i32_0 : i32, i32
  }
  func.func @transform_7(%arg0: i32) -> (i32, i32) {
    %c0_i32 = arith.constant 0 : i32
    %c0_i32_0 = arith.constant 0 : i32
    return %arg0, %c0_i32 : i32, i32
  }
}

</mosaic_0001>

<bundles_post_ra>
// kernel: _fused_mlp_impl.1
= control target key start
LH: loop header
LB: loop body
LE: loop exit
PB: predicated region body
PF: predicated region fallthrough
CT: control target
= control target key end

     0   :  { %v734_v3 = vmov 0.0|0.0   ;;  %vm735_vm0 = vmmov 0   ;;  %v736_v6 = vmov 0.0   ;;  %s986_s0 = inlined_call_operand.vmem [shape: f32[8,128], index: 0, kind: input, shape index: {}]   ;;  %s987_s1 = inlined_call_operand.vmem [shape: f32[128,128], index: 1, kind: input, shape index: {}]   ;;  %s988_s2 = inlined_call_operand.vmem [shape: f32[1,128], index: 2, kind: input, shape index: {}]   ;;  %s989_s3 = inlined_call_operand.vmem [shape: f32[128,128], index: 3, kind: input, shape index: {}]   ;;  %s990_s4 = inlined_call_operand.vmem [shape: f32[1,128], index: 4, kind: input, shape index: {}]   ;;  %s991_s5 = inlined_call_operand.vmem [shape: f32[128,128], index: 5, kind: input, shape index: {}]   ;;  %s992_s6 = inlined_call_operand.vmem [shape: f32[1,128], index: 6, kind: input, shape index: {}]   ;;  %s993_s7 = inlined_call_operand.hbm [shape: f32[8,128], index: 7, kind: output, shape index: {}]  }
   0x1   :  { %v28_v0 = vld [vmem:[%s987_s1] sm:$0xff]  ;;  %v29_v1 = vld [vmem:[%s987_s1 + $0x8] sm:$0xff]  ;;  %v30_v2 = vld [vmem:[%s987_s1 + $0x10] sm:$0xff]  ;;  %610 = vmatprep.subr.bf16.mxu0 %v734_v3  ;;  %502 = vmatprep.mubr.msk.f32.mxu0 %vm735_vm0, %v736_v6 }
   0x2   :  { %v611_v4 = vpack.c.bf16 %v29_v1, %v28_v0  ;;  %v31_v5 = vld [vmem:[%s987_s1 + $0x18] sm:$0xff]  ;;  %634 = vmatprep.subr.bf16.mxu1 %v734_v3  ;;  %537 = vmatprep.mubr.msk.f32.mxu1 %vm735_vm0, %v736_v6  ;;  %v32_v8 = vld [vmem:[%s987_s1 + $0x20] sm:$0xff]  ;;  %v33_v9 = vld [vmem:[%s987_s1 + $0x28] sm:$0xff] }
   0x3   :  { %v614_v7 = vpack.c.bf16 %v31_v5, %v30_v2  ;;  %v123_v10 = vld [vmem:[%s989_s3] sm:$0xff]  ;;  %v124_v11 = vld [vmem:[%s989_s3 + $0x8] sm:$0xff]  ;;  %v125_v12 = vld [vmem:[%s989_s3 + $0x10] sm:$0xff]  ;;  %v617_v14 = vpack.c.bf16 %v33_v9, %v32_v8 }
   0x4   :  { %612 = vmatpush3.bf16.msra.mxu0 %v611_v4  ;;  %v126_v13 = vld [vmem:[%s989_s3 + $0x18] sm:$0xff]  ;;  %v635_v15 = vpack.c.bf16 %v124_v11, %v123_v10  ;;  %v34_v16 = vld [vmem:[%s987_s1 + $0x30] sm:$0xff]  ;;  %v127_v19 = vld [vmem:[%s989_s3 + $0x20] sm:$0xff] }
   0x5   :  { %613 = vmatprep.subr.bf16.mxu0 %v734_v3  ;;  %v35_v17 = vld [vmem:[%s987_s1 + $0x38] sm:$0xff]  ;;  %v638_v18 = vpack.c.bf16 %v126_v13, %v125_v12  ;;  %v128_v20 = vld [vmem:[%s989_s3 + $0x28] sm:$0xff] }
   0x6   :  { %636 = vmatpush3.bf16.msra.mxu1 %v635_v15 }
   0x7   :  { %637 = vmatprep.subr.bf16.mxu1 %v734_v3 }
   0x8   :  { %615 = vmatpush3.bf16.msra.mxu0 %v614_v7 }
   0x9   :  { %616 = vmatprep.subr.bf16.mxu0 %v734_v3 }
   0xa   :  { %12 = vsyncpa [#allocation4], 0  ;;  %v620_v21 = vpack.c.bf16 %v35_v17, %v34_v16  ;;  %v36_v22 = vld [vmem:[%s987_s1 + $0x40] sm:$0xff]  ;;  %v37_v23 = vld [vmem:[%s987_s1 + $0x48] sm:$0xff]  ;;  %639 = vmatpush3.bf16.msra.mxu1 %v638_v18  ;;  %v641_v24 = vpack.c.bf16 %v128_v20, %v127_v19  ;;  %s737_s27 = smov [#allocation3]  }
   0xb   :  { %640 = vmatprep.subr.bf16.mxu1 %v734_v3  ;;  %v129_v25 = vld [vmem:[%s989_s3 + $0x30] sm:$0xff]  ;;  %v130_v26 = vld [vmem:[%s989_s3 + $0x38] sm:$0xff]  ;;  %v623_v27 = vpack.c.bf16 %v37_v23, %v36_v22  ;;  %v131_v31 = vld [vmem:[%s989_s3 + $0x40] sm:$0xff]  ;;  %s391_s28 = sshll.u32 %s737_s27, 4  ;;  %s392_s28 = int_to_ptr.vmem [resolvable:$true] %s391_s28 }
   0xc   :  { %618 = vmatpush3.bf16.msra.mxu0 %v617_v14  ;;  %v38_v28 = vld [vmem:[%s987_s1 + $0x50] sm:$0xff]  ;;  %v39_v29 = vld [vmem:[%s987_s1 + $0x58] sm:$0xff]  ;;  %v644_v30 = vpack.c.bf16 %v130_v26, %v129_v25  ;;  %v132_v32 = vld [vmem:[%s989_s3 + $0x48] sm:$0xff]  ;;  %s710_s29 = scalar_lea.vmem %s392_s28, 128  ;;  %p715_p1 = scmp.lt.s32.totalorder %s392_s28, %s392_s28 }
   0xd   :  { %619 = vmatprep.subr.bf16.mxu0 %v734_v3  ;;  %v626_v33 = vpack.c.bf16 %v39_v29, %v38_v28  ;;  %v40_v34 = vld [vmem:[%s987_s1 + $0x60] sm:$0xff]  ;;  %v41_v35 = vld [vmem:[%s987_s1 + $0x68] sm:$0xff]  ;;  %v647_v36 = vpack.c.bf16 %v132_v32, %v131_v31  ;;  %v133_v37 = vld [vmem:[%s989_s3 + $0x50] sm:$0xff]  ;;  %p711_p0 = scmp.ne.s32.totalorder %s392_s28, %s710_s29  ;;  %p716_p2 = scmp.lt.s32.totalorder %s710_s29, %s710_s29 }
   0xe   :  { %642 = vmatpush3.bf16.msra.mxu1 %v641_v24  ;;  %v134_v38 = vld [vmem:[%s989_s3 + $0x58] sm:$0xff]  ;;  %v629_v39 = vpack.c.bf16 %v41_v35, %v40_v34  ;;  %v42_v40 = vld [vmem:[%s987_s1 + $0x70] sm:$0xff]  ;;  %v135_v43 = vld [vmem:[%s989_s3 + $0x60] sm:$0xff] }
   0xf   :  { %643 = vmatprep.subr.bf16.mxu1 %v734_v3  ;;  %v43_v41 = vld [vmem:[%s987_s1 + $0x78] sm:$0xff]  ;;  %v650_v42 = vpack.c.bf16 %v134_v38, %v133_v37  ;;  %v136_v44 = vld [vmem:[%s989_s3 + $0x68] sm:$0xff]  ;;  %v27_v47 = vld [vmem:[%s986_s0] sm:$0xff]  ;;  %p717_p3 = por %p716_p2, %p715_p1 }
  0x10   :  { %621 = vmatpush3.bf16.msra.mxu0 %v620_v21  ;;  %v632_v45 = vpack.c.bf16 %v43_v41, %v42_v40  ;;  %v653_v46 = vpack.c.bf16 %v136_v44, %v135_v43  ;;  %v137_v48 = vld [vmem:[%s989_s3 + $0x70] sm:$0xff]  ;;  %v138_v49 = vld [vmem:[%s989_s3 + $0x78] sm:$0xff]  ;;  %v399_v51 = vld [vmem:[%s988_s2] ss:$0 sm:$0xff] }
  0x11   :  { %622 = vmatprep.subr.bf16.mxu0 %v734_v3  ;;  %v656_v50 = vpack.c.bf16 %v138_v49, %v137_v48  ;;  %v291_v56 = vld [vmem:[%s991_s5] sm:$0xff]  ;;  %v292_v57 = vld [vmem:[%s991_s5 + $0x8] sm:$0xff]  ;;  %v293_v58 = vld [vmem:[%s991_s5 + $0x10] sm:$0xff]  ;;  %p718_p4 = pnand %p717_p3, %p711_p0 }
  0x12   :  { %645 = vmatpush3.bf16.msra.mxu1 %v644_v30  ;;  %v683_v59 = vpack.c.bf16 %v292_v57, %v291_v56  ;;  %v294_v60 = vld [vmem:[%s991_s5 + $0x18] sm:$0xff]  ;;  %v295_v62 = vld [vmem:[%s991_s5 + $0x20] sm:$0xff]  ;;  %v296_v63 = vld [vmem:[%s991_s5 + $0x28] sm:$0xff] }
  0x13   :  { %646 = vmatprep.subr.bf16.mxu1 %v734_v3  ;;  %v686_v61 = vpack.c.bf16 %v294_v60, %v293_v58  ;;  %v689_v0 = vpack.c.bf16 %v296_v63, %v295_v62  ;;  %v297_v1 = vld [vmem:[%s991_s5 + $0x30] sm:$0xff]  ;;  %v298_v2 = vld [vmem:[%s991_s5 + $0x38] sm:$0xff]  ;;  %v299_v5 = vld [vmem:[%s991_s5 + $0x40] sm:$0xff] }
  0x14   :  { %624 = vmatpush3.bf16.msra.mxu0 %v623_v27  ;;  %v692_v4 = vpack.c.bf16 %v298_v2, %v297_v1  ;;  %v301_v8 = vld [vmem:[%s991_s5 + $0x50] sm:$0xff]  ;;  %v302_v9 = vld [vmem:[%s991_s5 + $0x58] sm:$0xff]  ;;  %v303_v11 = vld [vmem:[%s991_s5 + $0x60] sm:$0xff] }
  0x15   :  { %625 = vmatprep.subr.bf16.mxu0 %v734_v3  ;;  %v698_v10 = vpack.c.bf16 %v302_v9, %v301_v8  ;;  %v304_v12 = vld [vmem:[%s991_s5 + $0x68] sm:$0xff]  ;;  %v400_v14 = vld [vmem:[%s990_s4] ss:$0 sm:$0xff]  ;;  %v305_v19 = vld [vmem:[%s991_s5 + $0x70] sm:$0xff] }
  0x16   :  { %648 = vmatpush3.bf16.msra.mxu1 %v647_v36  ;;  %v701_v13 = vpack.c.bf16 %v304_v12, %v303_v11  ;;  %v306_v20 = vld [vmem:[%s991_s5 + $0x78] sm:$0xff]  ;;  %v401_v25 = vld [vmem:[%s992_s6] ss:$0 sm:$0xff] }
  0x17   :  { %649 = vmatprep.subr.bf16.mxu1 %v734_v3  ;;  %v704_v21 = vpack.c.bf16 %v306_v20, %v305_v19 }
  0x18   :  { %627 = vmatpush3.bf16.msra.mxu0 %v626_v33 }
  0x19   :  { %628 = vmatprep.subr.bf16.mxu0 %v734_v3 }
  0x1a   :  { %651 = vmatpush3.bf16.msra.mxu1 %v650_v42 }
  0x1b   :  { %652 = vmatprep.subr.bf16.mxu1 %v734_v3 }
  0x1c   :  { %630 = vmatpush3.bf16.msra.mxu0 %v629_v39 }
  0x1d   :  { %631 = vmatprep.subr.bf16.mxu0 %v734_v3 }
  0x1e   :  { %654 = vmatpush3.bf16.msra.mxu1 %v653_v46 }
  0x1f   :  { %655 = vmatprep.subr.bf16.mxu1 %v734_v3 }
  0x20   :  { %633 = vmatpush3.bf16.msra.mxu0 %v632_v45 }
  0x21   :  { %658 = vmatprep.subr.bf16.mxu0 %v734_v3 }
  0x22   :  { %657 = vmatpush3.bf16.msra.mxu1 %v656_v50 }
  0x23   :  { %503 = vmatmul.mubr.f32.vlgmr.msra.gmra.mrb[0].mxu0 %v27_v47  ;;  %682 = vmatprep.subr.bf16.mxu1 %v734_v3 }
  0x24   :  { %660 = vmatpush3.bf16.msra.mxu0 %v635_v15  ;;  %572 = vmatprep.mubr.msk.f32.mxu0 %vm735_vm0, %v736_v6 }
  0x25   :  { %661 = vmatprep.subr.bf16.mxu0 %v734_v3 }
  0x28   :  { %663 = vmatpush3.bf16.msra.mxu0 %v638_v18 }
  0x29   :  { %664 = vmatprep.subr.bf16.mxu0 %v734_v3 }
  0x2c   :  { %666 = vmatpush3.bf16.msra.mxu0 %v641_v24 }
  0x2d   :  { %667 = vmatprep.subr.bf16.mxu0 %v734_v3 }
  0x30   :  { %669 = vmatpush3.bf16.msra.mxu0 %v644_v30 }
  0x31   :  { %670 = vmatprep.subr.bf16.mxu0 %v734_v3 }
  0x34   :  { %672 = vmatpush3.bf16.msra.mxu0 %v647_v36 }
  0x35   :  { %673 = vmatprep.subr.bf16.mxu0 %v734_v3 }
  0x38   :  { %675 = vmatpush3.bf16.msra.mxu0 %v650_v42 }
  0x39   :  { %676 = vmatprep.subr.bf16.mxu0 %v734_v3 }
  0x3c   :  { %678 = vmatpush3.bf16.msra.mxu0 %v653_v46 }
  0x3d   :  { %679 = vmatprep.subr.bf16.mxu0 %v734_v3 }
  0x40   :  { %681 = vmatpush3.bf16.msra.mxu0 %v656_v50 }
  0xf6   :  { %v117_v52 = vpop.f32.mrb[0].mxu0 }
  0xf7   :  { %v118_v53 = vadd.f32 %v399_v51, %v117_v52  ;;  %v504_v54 = vpop.f32.mrb[1].mxu0 }
  0xf9   :  { %v121_v55 = vmax.f32 %v118_v53, 0.0 }
  0xfb   :  { %538 = vmatmul.mubr.f32.vlgmr.msra.gmra.mrb[0].mxu1 %v121_v55 }
  0xfc   :  { %607 = vmatprep.mubr.msk.f32.mxu1 %vm735_vm0, %v736_v6  ;;  %684 = vmatpush3.bf16.msra.mxu1 %v683_v59  ;;  %v300_v6 = vld [vmem:[%s991_s5 + $0x48] sm:$0xff] }
  0xfd   :  { %685 = vmatprep.subr.bf16.mxu1 %v734_v3  ;;  %v695_v7 = vpack.c.bf16 %v300_v6, %v299_v5 }
 0x100   :  { %687 = vmatpush3.bf16.msra.mxu1 %v686_v61 }
 0x101   :  { %688 = vmatprep.subr.bf16.mxu1 %v734_v3 }
 0x104   :  { %690 = vmatpush3.bf16.msra.mxu1 %v689_v0 }
 0x105   :  { %691 = vmatprep.subr.bf16.mxu1 %v734_v3 }
 0x108   :  { %693 = vmatpush3.bf16.msra.mxu1 %v692_v4 }
 0x109   :  { %694 = vmatprep.subr.bf16.mxu1 %v734_v3 }
 0x10c   :  { %696 = vmatpush3.bf16.msra.mxu1 %v695_v7 }
 0x10d   :  { %697 = vmatprep.subr.bf16.mxu1 %v734_v3 }
 0x110   :  { %699 = vmatpush3.bf16.msra.mxu1 %v698_v10 }
 0x111   :  { %700 = vmatprep.subr.bf16.mxu1 %v734_v3 }
 0x114   :  { %702 = vmatpush3.bf16.msra.mxu1 %v701_v13 }
 0x115   :  { %703 = vmatprep.subr.bf16.mxu1 %v734_v3 }
 0x118   :  { %705 = vmatpush3.bf16.msra.mxu1 %v704_v21 }
 0x1ce   :  { %v213_v15 = vpop.f32.mrb[0].mxu1 }
 0x1cf   :  { %v214_v16 = vadd.f32 %v400_v14, %v213_v15  ;;  %v539_v17 = vpop.f32.mrb[1].mxu1 }
 0x1d1   :  { %v217_v18 = vmax.f32 %v214_v16, 0.0 }
 0x1d3   :  { %573 = vmatmul.mubr.f32.vlgmr.msra.gmra.mrb[2].mxu0 %v217_v18 }
 0x2a6   :  { %v284_v3 = vpop.f32.mrb[2].mxu0 }
 0x2a7   :  { %v285_v22 = vadd.f32 %v400_v14, %v284_v3  ;;  %v574_v23 = vpop.f32.mrb[3].mxu0 }
 0x2a9   :  { %v288_v24 = vmax.f32 %v285_v22, 0.0 }
 0x2ab   :  { %608 = vmatmul.mubr.f32.vlgmr.msra.gmra.mrb[2].mxu1 %v288_v24 }
 0x37e   :  { %v380_v26 = vpop.f32.mrb[2].mxu1 }
 0x37f   :  { %v381_v27 = vadd.f32 %v401_v25, %v380_v26  ;;  %v609_v28 = vpop.f32.mrb[3].mxu1 }
 0x381   :  { %384 = vst [vmem:[#allocation3] sm:$0xff] %v381_v27 }
 0x382   :  { %721 = shalt.err (!%p718_p4)
}
 0x383   :  { %s722_s8 = scalar_lea.hbm %s993_s7, 128 }
 0x384   :  { %p723_p5 = scmp.ne.s32.totalorder %s993_s7, %s722_s8  ;;  %p726_p6 = scmp.lt.u32.totalorder %s722_s8, %s993_s7 }
 0x386   :  { %p728_p7 = pnand %p726_p6, %p723_p5 }
 0x388   :  { %731 = shalt.err (!%p728_p7)
}
 0x389   :  { %394 = dma.vmem_to_hbm [thread:$0]  %s392_s28, 128, %s993_s7, [#allocation4]  }
 0x38a   :  { %732 = dma.done.wait [#allocation4], 128  }
 0x38b   :  { %733 = vsyncadd [#allocation4], 4294967168 }
 0x38c   :  { %398 = vsyncpa [#allocation4], 1 }

</bundles_post_ra>
